<compile_context>
chip_gen: v7x
topology: tpu7x:2x2x1
jax: 0.10.0
libtpu: 0.0.40
codegen_flags: <defaults>
</compile_context>

<pallas_src>
import jax
import jax.numpy as jnp
import numpy as np
from jax.experimental import pallas as pl
from jax.experimental.pallas import tpu as pltpu


def _make_concat_kernel(C: int):
    def kernel(x_ref, o_ref):
        # x_ref: (TB, C, HW) VMEM tile; o_ref: (TB, C+1, HW) VMEM tile.
        xv = x_ref[...]
        o_ref[:, 0:C, :] = xv                  # bulk copy of all C channels
        o_ref[:, C:C + 1, :] = xv[:, 0:1, :]   # duplicate channel 0 (already resident in VMEM)
    return kernel


# Double-buffered (in + out) block budget.  Conservative enough that the
# default scoped-VMEM limit suffices on every chip (v5e 16 MiB, v6e/v7x 32 MiB),
# while still being far above the ~1 MiB tile size needed to reach ~85% of the
# HBM roofline for a copy.
_VMEM_BLOCK_BUDGET_BYTES = 8 * 1024 * 1024
# Below this total problem size the fixed ~0.35 us per-grid-step overhead
# dominates -> collapse to a single grid step.
_SINGLE_STEP_BYTES = 512 * 1024


def _pick_tb(B: int, per_batch_bytes: int) -> int:
    """Largest divisor of B whose double-buffered block footprint fits VMEM."""
    total_bytes = B * per_batch_bytes
    tb_cap = max(1, _VMEM_BLOCK_BUDGET_BYTES // (2 * per_batch_bytes))
    if B >= 2 and total_bytes > _SINGLE_STEP_BYTES:
        # Keep >= 2 grid steps so "parallel" can shard across v7x's two TCs.
        tb_cap = min(tb_cap, B // 2)
    tb_cap = max(1, tb_cap)
    tb = 1
    for d in range(1, B + 1):
        if B % d == 0 and d <= tb_cap:
            tb = d
    return tb


def model_forward(x: jax.Array) -> jax.Array:
    """out = concat(x, x[:, 0:1]) along the channel axis (NCHW)."""
    B, C, H, W = x.shape
    HW = H * W
    dtype_bytes = jnp.dtype(x.dtype).itemsize
    # Free reshape for contiguous NCHW; block uses the full HW extent so this
    # is always legal, and lane-dense whenever H*W is a multiple of 128.
    x2 = x.reshape(B, C, HW)

    # HBM traffic: read B*C*HW, write B*(C+1)*HW.
    per_batch_bytes = (2 * C + 1) * HW * dtype_bytes
    TB = _pick_tb(B, per_batch_bytes)
    grid = (B // TB,)

    out2 = pl.pallas_call(
        _make_concat_kernel(C),
        out_shape=jax.ShapeDtypeStruct((B, C + 1, HW), x.dtype),
        grid=grid,
        in_specs=[pl.BlockSpec((TB, C, HW), lambda b: (b, 0, 0))],
        out_specs=pl.BlockSpec((TB, C + 1, HW), lambda b: (b, 0, 0)),
        compiler_params=pltpu.CompilerParams(
            dimension_semantics=("parallel",),
        ),
        cost_estimate=pl.CostEstimate(
            flops=0,
            transcendentals=0,
            bytes_accessed=B * per_batch_bytes,
        ),
    )(x2)

    return out2.reshape(B, C + 1, H, W)


if __name__ == "__main__":
    key = jax.random.PRNGKey(0)
    B, C, H, W = 2, 4, 16, 16
    x = jax.random.normal(key, (B, C, H, W), dtype=jnp.float32)

    out = jax.block_until_ready(model_forward(x))

    # Pure-JAX reference of the PyTorch forward
    ref = jnp.concatenate([x, x[:, 0:1]], axis=1)

    assert out.shape == (B, C + 1, H, W), out.shape
    np.testing.assert_allclose(np.asarray(out), np.asarray(ref), rtol=0, atol=0)
    print("KERNEL_OK")
</pallas_src>

<mosaic_0001>
module attributes {stable_mosaic.version = 11 : i64} {
  func.func @kernel(%arg0: i32, %arg1: memref<2x4x256xf32, #tpu.memory_space<vmem>>, %arg2: memref<2x5x256xf32, #tpu.memory_space<vmem>>) attributes {dimension_semantics = [#tpu.dimension_semantics<parallel>], iteration_bounds = array<i64: 1>, scalar_prefetch = 0 : i64, scratch_operands = 0 : i64, tpu.core_type = #tpu.core_type<tc>, window_params = [{transform_indices = @transform_0, window_bounds = array<i64: 2, 4, 256>}, {transform_indices = @transform_1, window_bounds = array<i64: 2, 5, 256>}]} {
    %c0 = arith.constant 0 : index
    %c0_0 = arith.constant 0 : index
    %c0_1 = arith.constant 0 : index
    %0 = vector.load %arg1[%c0, %c0_0, %c0_1] : memref<2x4x256xf32, #tpu.memory_space<vmem>>, vector<2x4x256xf32>
    %c0_2 = arith.constant 0 : index
    %c0_3 = arith.constant 0 : index
    %c0_4 = arith.constant 0 : index
    %1 = vector.load %arg2[%c0_2, %c0_3, %c0_4] : memref<2x5x256xf32, #tpu.memory_space<vmem>>, vector<2x4x256xf32>
    tpu.vector_store %arg2[%c0_2, %c0_3, %c0_4], %0 {strides = array<i32>} : memref<2x5x256xf32, #tpu.memory_space<vmem>>, vector<2x4x256xf32>,
    %2 = vector.extract_strided_slice %0 {offsets = [0, 0, 0], sizes = [2, 1, 256], strides = [1, 1, 1]} : vector<2x4x256xf32> to vector<2x1x256xf32>
    %c0_5 = arith.constant 0 : index
    %c4 = arith.constant 4 : index
    %c0_6 = arith.constant 0 : index
    %3 = vector.load %arg2[%c0_5, %c4, %c0_6] : memref<2x5x256xf32, #tpu.memory_space<vmem>>, vector<2x1x256xf32>
    tpu.vector_store %arg2[%c0_5, %c4, %c0_6], %2 {strides = array<i32>} : memref<2x5x256xf32, #tpu.memory_space<vmem>>, vector<2x1x256xf32>,
    return
  }
  func.func @transform_0(%arg0: i32) -> (i32, i32, i32) {
    %c0_i32 = arith.constant 0 : i32
    %c0_i32_0 = arith.constant 0 : i32
    %c0_i32_1 = arith.constant 0 : i32
    return %arg0, %c0_i32, %c0_i32_0 : i32, i32, i32
  }
  func.func @transform_1(%arg0: i32) -> (i32, i32, i32) {
    %c0_i32 = arith.constant 0 : i32
    %c0_i32_0 = arith.constant 0 : i32
    %c0_i32_1 = arith.constant 0 : i32
    return %arg0, %c0_i32, %c0_i32_0 : i32, i32, i32
  }
}

</mosaic_0001>

<bundles_post_ra>
// kernel: tpu_custom_call.1
= control target key start
LH: loop header
LB: loop body
LE: loop exit
PB: predicated region body
PF: predicated region fallthrough
CT: control target
= control target key end

     0   :  { %6 = vsyncpa [#allocation3], 0  ;;  %s111_s6 = smov [#allocation2]   ;;  %s155_s0 = inlined_call_operand.hbm [shape: f32[2,4,256], index: 0, kind: input, shape index: {}]   ;;  %s156_s1 = inlined_call_operand.vmem [shape: f32[2,5,256], index: 1, kind: output, shape index: {}]  }
   0x1   :  { %s12_s7 = sshll.u32 %s111_s6, 4  ;;  %s87_s10 = scalar_lea.hbm %s155_s0, 256  ;;  %s13_s7 = int_to_ptr.vmem [resolvable:$true] %s12_s7 }
   0x2   :  { %p88_p0 = scmp.ne.s32.totalorder %s155_s0, %s87_s10  ;;  %p91_p1 = scmp.lt.u32.totalorder %s87_s10, %s155_s0 }
   0x4   :  { %p93_p2 = pnand %p91_p1, %p88_p0 }
   0x6   :  { %96 = shalt.err (!%p93_p2)
}
   0x7   :  { %s97_s15 = scalar_lea.vmem %s13_s7, 256  ;;  %p102_p4 = scmp.lt.s32.totalorder %s13_s7, %s13_s7 }
   0x8   :  { %p98_p3 = scmp.ne.s32.totalorder %s13_s7, %s97_s15  ;;  %p103_p5 = scmp.lt.s32.totalorder %s97_s15, %s97_s15 }
   0xa   :  { %p104_p6 = por %p103_p5, %p102_p4 }
   0xc   :  { %p105_p7 = pnand %p104_p6, %p98_p3 }
   0xe   :  { %108 = shalt.err (!%p105_p7)
}
   0xf   :  { %s112_s16 = smov 128   ;;  %s113_s17 = smov 8  }
  0x10   :  { %18 = dma.hbm_to_vmem [thread:$0]  %s155_s0, 256, %s13_s7, [#allocation3], %s112_s16, %s112_s16, %s113_s17  }
  0x11   :  { %109 = dma.done.wait [#allocation3], 256  }
  0x12   :  { %110 = vsyncadd [#allocation3], 4294967040  ;;  %v37_v0 = vlaneseq  ;;  %v114_v1 = vmov 1966171168   ;;  %v22_v6 = vld [vmem:[#allocation2] sm:$0xff]  ;;  %v23_v7 = vld [vmem:[#allocation2 + $0x8] sm:$0xff] }
  0x13   :  { %v35_v2 = vunpack.c.l.s4 %v114_v1  ;;  %30 = vst [vmem:[%s156_s1] sm:$0xf] %v22_v6  ;;  %v26_v8 = vcombine.high %v22_v6, %v22_v6  ;;  %32 = vst [vmem:[%s156_s1 + $0x10] sm:$0xf] %v23_v7  ;;  %v27_v9 = vcombine.high %v23_v7, %v23_v7 }
  0x14   :  { %v38_v3 = vshrl.u32 %v37_v0, 7  ;;  %vm66_vm0 = vcmp.lt.s32.totalorder %v37_v0, 256 }
  0x15   :  { %v36_v4 = vunpack.c.0.s8 %v35_v2  ;;  %31 = vst [vmem:[%s156_s1 + $0x8] sm:$0xf] %v26_v8  ;;  %33 = vst [vmem:[%s156_s1 + $0x18] sm:$0xf] %v27_v9 }
  0x17   :  { %v39_v5 = vsub.s32 %v36_v4, %v38_v3 }
  0x19   :  { %v40_v10 = vrot.slane %v22_v6, %v39_v5  ;;  %v54_v11 = vrot.slane %v23_v7, %v39_v5 }
  0x1b   :  { %v47_v12 = vrot.slane %v40_v10, %v39_v5  ;;  %v61_v13 = vrot.slane %v54_v11, %v39_v5 }
  0x1d   :  { %79 = vst.msk [vmem:[%s156_s1 + $0x4] ss:$8 sm:$0x3] %vm66_vm0, %v47_v12  ;;  %80 = vst.msk [vmem:[%s156_s1 + $0x14] ss:$8 sm:$0x3] %vm66_vm0, %v61_v13 }
  0x1e   :  { %78 = vsyncpa [#allocation3], 1 }

</bundles_post_ra>
